<compile_context>
chip_gen: v5e
topology: v5e:2x2
jax: 0.10.0
libtpu: 0.0.40
codegen_flags: <defaults>
</compile_context>

<pallas_src>
from functools import partial

import jax
import jax.numpy as jnp
from jax.experimental import pallas as pl
from jax.experimental.pallas import tpu as pltpu


# ---------------------------------------------------------------------------
# Fused Pallas kernel: L2-normalize + (K,C)@(C,HW_tile) + scale + bias
# ---------------------------------------------------------------------------
def _contrastive_kernel(params_ref, x_ref, w_ref, o_ref):
    # params_ref: SMEM f32[2] = [exp(logit_scale), bias]
    # x_ref:      VMEM (C, Thw)  image features, one batch / one spatial tile
    #             (this is the native NCHW slab -> no transpose anywhere)
    # w_ref:      VMEM (K, C)    text features, one batch
    # o_ref:      VMEM (K, Thw)  region-text logits (native bkhw layout)
    x = x_ref[...]
    w = w_ref[...]

    # F.normalize(p=2, eps=1e-12): v / max(||v||, eps) == v * rsqrt(max(||v||^2, eps^2))
    # Done in f32; rsqrt goes to the EUP slot.
    x_inv = jax.lax.rsqrt(jnp.maximum(jnp.sum(x * x, axis=0, keepdims=True), 1e-24))
    w_inv = jax.lax.rsqrt(jnp.maximum(jnp.sum(w * w, axis=1, keepdims=True), 1e-24))

    # bf16 operands for native MXU throughput; accumulate in f32.
    xn = (x * x_inv).astype(jnp.bfloat16)   # (C, Thw)
    wn = (w * w_inv).astype(jnp.bfloat16)   # (K, C)

    s = jnp.dot(wn, xn, preferred_element_type=jnp.float32)   # (K, Thw)

    # Epilogue in f32: logits * exp(logit_scale) + bias  (scalars from SMEM).
    o_ref[...] = s * params_ref[0] + params_ref[1]


def _pick_spatial_tile(hw, max_tile=512):
    """Largest multiple of 128 that divides hw (capped at max_tile); else full hw."""
    if hw % 128 != 0:
        return hw  # full-extent block is always legal
    t = min(max_tile, hw)
    t -= t % 128
    while hw % t != 0:
        t -= 128
    return t


@partial(jax.jit, static_argnames=("block_hw",))
def contrastive_head(x, w, logit_scale, bias, block_hw=512):
    """x: (B, C, H, W) f32, w: (B, K, C) f32 -> (B, K, H, W) f32."""
    B, C, H, W = x.shape
    Bw, K, Cw = w.shape
    assert Bw == B and Cw == C, (x.shape, w.shape)
    HW = H * W
    bhw = _pick_spatial_tile(HW, block_hw)
    grid = (B, HW // bhw)

    x2 = x.reshape(B, C, HW)  # pure reshape: NCHW is already the kernel layout
    params = jnp.stack(
        [jnp.exp(logit_scale), jnp.asarray(bias, jnp.float32)]
    ).astype(jnp.float32)

    cost = pl.CostEstimate(
        flops=2 * B * K * C * HW + 4 * B * C * HW + 4 * B * K * C + 2 * B * K * HW,
        transcendentals=B * (HW + K),
        bytes_accessed=4 * (B * C * HW + B * K * C + B * K * HW) + 8,
    )

    out = pl.pallas_call(
        _contrastive_kernel,
        out_shape=jax.ShapeDtypeStruct((B, K, HW), jnp.float32),
        grid=grid,
        in_specs=[
            pl.BlockSpec(memory_space=pltpu.MemorySpace.SMEM),          # scalars
            pl.BlockSpec((None, C, bhw), lambda b, t: (b, 0, t)),       # x slab
            pl.BlockSpec((None, K, C), lambda b, t: (b, 0, 0)),         # w slab
        ],
        out_specs=pl.BlockSpec((None, K, bhw), lambda b, t: (b, 0, t)),
        compiler_params=pltpu.CompilerParams(
            dimension_semantics=("parallel", "parallel"),
        ),
        cost_estimate=cost,
    )(params, x2, w)

    return out.reshape(B, K, H, W)


# ---------------------------------------------------------------------------
# Module wrapper (matches the PyTorch parameterization)
# ---------------------------------------------------------------------------
class ContrastiveHeadPallas:
    def __init__(self, bias=0.0, logit_scale=None):
        self.bias = jnp.float32(bias)
        self.logit_scale = (
            jnp.log(jnp.float32(1.0 / 0.07)) if logit_scale is None
            else jnp.float32(logit_scale)
        )

    def __call__(self, x, w):
        return contrastive_head(x, w, self.logit_scale, self.bias)


# ---------------------------------------------------------------------------
# Pure-JAX reference (f32, HIGHEST precision) for correctness checking
# ---------------------------------------------------------------------------
def ref_contrastive_head(x, w, logit_scale, bias):
    xn = x / jnp.maximum(jnp.linalg.norm(x, axis=1, keepdims=True), 1e-12)
    wn = w / jnp.maximum(jnp.linalg.norm(w, axis=-1, keepdims=True), 1e-12)
    s = jnp.einsum("bchw,bkc->bkhw", xn, wn, precision=jax.lax.Precision.HIGHEST)
    return s * jnp.exp(logit_scale) + bias


if __name__ == "__main__":
    key = jax.random.PRNGKey(0)
    kx, kw = jax.random.split(key)

    # Small, module-consistent shapes: B=2 images, C=32 feature channels,
    # 16x16 spatial, K=8 text embeddings.
    B, C, H, W, K = 2, 32, 16, 16, 8
    x = jax.random.normal(kx, (B, C, H, W), jnp.float32)
    w = jax.random.normal(kw, (B, K, C), jnp.float32)

    head = ContrastiveHeadPallas(bias=0.1)  # nonzero bias to exercise the add
    out = jax.block_until_ready(head(x, w))

    assert out.shape == (B, K, H, W), out.shape
    ref = ref_contrastive_head(x, w, head.logit_scale, head.bias)
    # bf16 MXU operands (values scaled by exp(logit_scale) ~= 14.3) -> loose-ish atol.
    assert jnp.allclose(out, ref, atol=1e-1, rtol=1e-2), float(
        jnp.max(jnp.abs(out - ref))
    )
    print("KERNEL_OK")
</pallas_src>

<mosaic_0001>
module attributes {stable_mosaic.version = 11 : i64} {
  func.func @_contrastive_kernel(%arg0: i32, %arg1: i32, %arg2: memref<2xf32, #tpu.memory_space<smem>>, %arg3: memref<1x32x256xf32, #tpu.memory_space<vmem>>, %arg4: memref<1x8x32xf32, #tpu.memory_space<vmem>>, %arg5: memref<1x8x256xf32, #tpu.memory_space<vmem>>) attributes {dimension_semantics = [#tpu.dimension_semantics<parallel>, #tpu.dimension_semantics<parallel>], iteration_bounds = array<i64: 2, 1>, scalar_prefetch = 0 : i64, scratch_operands = 0 : i64, tpu.core_type = #tpu.core_type<tc>, window_params = [{transform_indices = @transform_0, window_bounds = array<i64: 2>}, {transform_indices = @transform_1, window_bounds = array<i64: 1, 32, 256>}, {transform_indices = @transform_2, window_bounds = array<i64: 1, 8, 32>}, {transform_indices = @transform_3, window_bounds = array<i64: 1, 8, 256>}]} {
    %c0 = arith.constant 0 : index
    %c0_0 = arith.constant 0 : index
    %c0_1 = arith.constant 0 : index
    %0 = vector.load %arg3[%c0, %c0_0, %c0_1] : memref<1x32x256xf32, #tpu.memory_space<vmem>>, vector<1x32x256xf32>
    %1 = vector.shape_cast %0 : vector<1x32x256xf32> to vector<32x256xf32>
    %c0_2 = arith.constant 0 : index
    %c0_3 = arith.constant 0 : index
    %c0_4 = arith.constant 0 : index
    %2 = vector.load %arg4[%c0_2, %c0_3, %c0_4] : memref<1x8x32xf32, #tpu.memory_space<vmem>>, vector<1x8x32xf32>
    %3 = vector.shape_cast %2 : vector<1x8x32xf32> to vector<8x32xf32>
    %4 = arith.mulf %1, %1 : vector<32x256xf32>
    %cst = arith.constant dense<0.000000e+00> : vector<256xf32>
    %5 = vector.multi_reduction <add>, %4, %cst [0] : vector<32x256xf32> to vector<256xf32>
    %6 = vector.shape_cast %5 : vector<256xf32> to vector<1x256xf32>
    %cst_5 = arith.constant 1.000000e-24 : f32
    %7 = vector.broadcast %cst_5 : f32 to vector<1x256xf32>
    %8 = arith.maximumf %6, %7 : vector<1x256xf32>
    %9 = math.rsqrt %8 : vector<1x256xf32>
    %10 = arith.mulf %3, %3 : vector<8x32xf32>
    %cst_6 = arith.constant dense<0.000000e+00> : vector<8xf32>
    %11 = vector.multi_reduction <add>, %10, %cst_6 [1] : vector<8x32xf32> to vector<8xf32>
    %12 = vector.shape_cast %11 : vector<8xf32> to vector<8x1xf32>
    %cst_7 = arith.constant 1.000000e-24 : f32
    %13 = vector.broadcast %cst_7 : f32 to vector<8x1xf32>
    %14 = arith.maximumf %12, %13 : vector<8x1xf32>
    %15 = math.rsqrt %14 : vector<8x1xf32>
    %16 = vector.broadcast %9 : vector<1x256xf32> to vector<32x256xf32>
    %17 = arith.mulf %1, %16 : vector<32x256xf32>
    %18 = arith.truncf %17 : vector<32x256xf32> to vector<32x256xbf16>
    %19 = vector.broadcast %15 : vector<8x1xf32> to vector<8x32xf32>
    %20 = arith.mulf %3, %19 : vector<8x32xf32>
    %21 = arith.truncf %20 : vector<8x32xf32> to vector<8x32xbf16>
    %cst_8 = arith.constant dense<0.000000e+00> : vector<8x256xf32>
    %22 = tpu.matmul %21, %18, %cst_8 {dimension_numbers = #tpu.dot_dimension_numbers<[1], [0], [0], [1], [0, 0, 1, 1], [], []>} : vector<8x32xbf16>, vector<32x256xbf16>, vector<8x256xf32> -> vector<8x256xf32>
    %c0_9 = arith.constant 0 : index
    %23 = memref.load %arg2[%c0_9] : memref<2xf32, #tpu.memory_space<smem>>
    %24 = vector.broadcast %23 : f32 to vector<8x256xf32>
    %25 = arith.mulf %22, %24 : vector<8x256xf32>
    %c1 = arith.constant 1 : index
    %26 = memref.load %arg2[%c1] : memref<2xf32, #tpu.memory_space<smem>>
    %27 = vector.broadcast %26 : f32 to vector<8x256xf32>
    %28 = arith.addf %25, %27 : vector<8x256xf32>
    %c0_10 = arith.constant 0 : index
    %c0_11 = arith.constant 0 : index
    %c0_12 = arith.constant 0 : index
    %29 = vector.load %arg5[%c0_10, %c0_11, %c0_12] : memref<1x8x256xf32, #tpu.memory_space<vmem>>, vector<1x8x256xf32>
    %30 = vector.shape_cast %29 : vector<1x8x256xf32> to vector<8x256xf32>
    %31 = vector.shape_cast %28 : vector<8x256xf32> to vector<1x8x256xf32>
    tpu.vector_store %arg5[%c0_10, %c0_11, %c0_12], %31 {strides = array<i32>} : memref<1x8x256xf32, #tpu.memory_space<vmem>>, vector<1x8x256xf32>,
    return
  }
  func.func @transform_0(%arg0: i32, %arg1: i32) -> i32 {
    %c0_i32 = arith.constant 0 : i32
    %c0_i32_0 = arith.constant 0 : i32
    return %c0_i32 : i32
  }
  func.func @transform_1(%arg0: i32, %arg1: i32) -> (i32, i32, i32) {
    %c0_i32 = arith.constant 0 : i32
    %c0_i32_0 = arith.constant 0 : i32
    return %arg0, %c0_i32, %arg1 : i32, i32, i32
  }
  func.func @transform_2(%arg0: i32, %arg1: i32) -> (i32, i32, i32) {
    %c0_i32 = arith.constant 0 : i32
    %c0_i32_0 = arith.constant 0 : i32
    %c0_i32_1 = arith.constant 0 : i32
    return %arg0, %c0_i32, %c0_i32_0 : i32, i32, i32
  }
  func.func @transform_3(%arg0: i32, %arg1: i32) -> (i32, i32, i32) {
    %c0_i32 = arith.constant 0 : i32
    %c0_i32_0 = arith.constant 0 : i32
    return %arg0, %c0_i32, %arg1 : i32, i32, i32
  }
}

</mosaic_0001>

<bundles_post_ra>
// kernel: contrastive_head.1
= control target key start
LH: loop header
LB: loop body
LE: loop exit
PB: predicated region body
PF: predicated region fallthrough
CT: control target
= control target key end

     0   :  { %8 = vsyncpa [#allocation3], 0  ;;  %s603_s12 = smov 0   ;;  %s605_s13 = smov 0   ;;  %s676_s0 = inlined_call_operand.vmem [shape: f32[2], index: 0, kind: input, shape index: {}]   ;;  %s677_s1 = inlined_call_operand.vmem [shape: f32[2,32,256], index: 1, kind: input, shape index: {}]   ;;  %s678_s2 = inlined_call_operand.vmem [shape: f32[2,8,32], index: 2, kind: input, shape index: {}]   ;;  %s679_s3 = inlined_call_operand.vmem [shape: f32[2,8,256], index: 3, kind: output, shape index: {}]  }
   0x1   :  { %s607_s14 = smov 0  }
   0x2 LB: > { %s479_s15 = sadd.s32 4294967295, %s580_s14   ;;  %s26_s16 = sadd.s32 1, %s576_s13  ;;  %s580_s14 = sphi %s607_s14, %s14_s14   ;;  %s576_s13 = sphi %s605_s13, %s681_s13   ;;  %s572_s12 = sphi %s603_s12, %s680_s12  }
   0x3   : > { %p28_p0 = scmp.ge.s32.totalorder %s26_s16, 2  ;;  %p481_p1 = scmp.ge.s32.totalorder %s580_s14, 1 }
   0x4   : > { %p134_p2 = scmp.lt.s32.totalorder %s580_s14, 3  ;;  %p506_p4 = scmp.eq.s32.totalorder %s479_s15, 0 }
   0x5   : > { %s683_s16 = smov (%p28_p0, %s26_s16), 0  ;;  %s146_s19 = sshll.u32 %s676_s0, 4  ;;  %s147_s19 = int_to_ptr.vmem [resolvable:$true] %s146_s19 }
   0x6   : > { %p135_p3 = pnand %p481_p1, %p134_p2  ;;  %s582_s20 = smov [#allocation2]  }
   0x8   : > { %p502_p5 = pneg %p135_p3  ;;  %179 = sbr.rel (%p135_p3) target bundleno = 299 (0x12b), region = 32 }
   0xa   : > { %p503_p6 = pnand %p506_p4, %p502_p5 }
   0xc   : > { %505 = dma.vmem_to_smem (!%p503_p6), %s147_s19, 16, %s582_s20, [#allocation3]  }
   0xd   : > { %567 = dma.done.wait (%p506_p4), [#allocation3], 16  }
   0xe   : > { %569 = vsyncadd (%p506_p4), [#allocation3], 4294967280 }
   0xf   : > { %186 = sfence }
  0x10   : > { %p218_p7 = scmp.lt.s32.totalorder %s572_s12, 1  ;;  %vm300_vm0 = vcmask 261120   ;;  %s358_s29 = sld [smem:[#allocation2]] }
  0x11   : > { %s493_s30 = sld [smem:[#allocation2 + $0x1]] }
  0x12   : > { %s685_s12 = smov (!%p218_p7, %s572_s12), 1 }
  0x13   : > { %s488_s21 = sshll.u32 %s685_s12, 3  ;;  %s496_s25 = sshll.u32 %s685_s12, 6 }
  0x14   : > { %s230_s24 = scalar_lea.vmem %s678_s2, %s488_s21  ;;  %s225_s28 = scalar_lea.vmem %s677_s1, %s496_s25 }
  0x15   : > { %v631_v0 = vld [vmem:[%s230_s24] sm:$0xff]  ;;  %v642_v4 = vld [vmem:[%s225_s28 + $0x10] sm:$0xff]  ;;  %v644_v5 = vld [vmem:[%s225_s28 + $0x8] sm:$0xff]  ;;  %s497_s4 = sshll.u32 %s685_s12, 4 }
  0x16   : > { %v299_v1 = vmul.f32 %v631_v0, %v631_v0  ;;  %v640_v3 = vld [vmem:[%s225_s28] sm:$0xff]  ;;  %v253_v7 = vmul.f32 %v642_v4, %v642_v4  ;;  %v650_v8 = vld [vmem:[%s225_s28 + $0x18] sm:$0xff]  ;;  %v252_v9 = vmul.f32 %v644_v5, %v644_v5  ;;  %v247_v11 = vld [vmem:[%s225_s28 + $0x28] sm:$0xff]  ;;  %s239_s7 = scalar_lea.vmem %s679_s3, %s497_s4 }
  0x17   : > { %v251_v6 = vmul.f32 %v640_v3, %v640_v3  ;;  %v246_v10 = vld [vmem:[%s225_s28 + $0x20] sm:$0xff]  ;;  %v254_v12 = vmul.f32 %v650_v8, %v650_v8  ;;  %v256_v15 = vmul.f32 %v247_v11, %v247_v11  ;;  %v248_v16 = vld [vmem:[%s225_s28 + $0x30] sm:$0xff]  ;;  %v249_v17 = vld [vmem:[%s225_s28 + $0x38] sm:$0xff] }
  0x18   : > { %v301_v2 = vsel %vm300_vm0, %v299_v1, 0.0  ;;  %v255_v13 = vmul.f32 %v246_v10, %v246_v10  ;;  %v257_v19 = vmul.f32 %v248_v16, %v248_v16  ;;  %v258_v21 = vmul.f32 %v249_v17, %v249_v17 }
  0x19   : > { %302 = vadd.xlane.f32.xlu0 %v301_v2  ;;  %v259_v14 = vadd.f32 %v253_v7, %v251_v6  ;;  %v268_v18 = vadd.f32 %v254_v12, %v252_v9 }
  0x1b   : > { %v260_v20 = vadd.f32 %v259_v14, %v255_v13  ;;  %v269_v22 = vadd.f32 %v268_v18, %v256_v15  ;;  %v359_v13 = vstv %s358_s29  ;;  %v363_v15 = vstv %s493_s30 }
  0x1d   : > { %v261_v23 = vadd.f32 %v260_v20, %v257_v19  ;;  %v270_v24 = vadd.f32 %v269_v22, %v258_v21 }
  0x1f   : > { %v262_v25 = vrot.slane %v261_v23, 4  ;;  %v271_v26 = vrot.slane %v270_v24, 4 }
  0x21   : > { %v263_v27 = vadd.f32 %v262_v25, %v261_v23  ;;  %v272_v28 = vadd.f32 %v271_v26, %v270_v24 }
  0x23   : > { %v264_v29 = vrot.slane %v263_v27, 2  ;;  %v273_v30 = vrot.slane %v272_v28, 2 }
  0x25   : > { %v265_v31 = vadd.f32 %v264_v29, %v263_v27  ;;  %v274_v32 = vadd.f32 %v273_v30, %v272_v28 }
  0x27   : > { %v266_v33 = vrot.slane %v265_v31, 1  ;;  %v275_v34 = vrot.slane %v274_v32, 1 }
  0x29   : > { %v267_v35 = vadd.f32 %v266_v33, %v265_v31  ;;  %v276_v36 = vadd.f32 %v275_v34, %v274_v32 }
  0x2b   : > { %v277_v37 = vmax.f32 %v267_v35, 1e-24  ;;  %v278_v38 = vmax.f32 %v276_v36, 1e-24 }
  0x2d   : > { %533 = vrsqrt.f32 %v277_v37  ;;  %vm285_vm1 = vweird.f32 %v277_v37  ;;  %vm295_vm3 = vweird.f32 %v278_v38 }
  0x2e   : > { %535 = vrsqrt.f32 %v278_v38 }
  0x33   : > { %v534_v39 = vpop.eup %533 }
  0x34   : > { %v536_v40 = vpop.eup %535  ;;  %v280_v41 = vmul.f32 %v534_v39, %v277_v37  ;;  %vm286_vm2 = vweird.f32 %v534_v39 }
  0x35   : > { %v290_v42 = vmul.f32 %v536_v40, %v278_v38  ;;  %vm287_vm4 = vmor %vm285_vm1, %vm286_vm2  ;;  %vm296_vm5 = vweird.f32 %v536_v40 }
  0x36   : > { %v281_v43 = vmul.f32 %v534_v39, %v280_v41  ;;  %vm297_vm6 = vmor %vm295_vm3, %vm296_vm5 }
  0x37   : > { %v291_v44 = vmul.f32 %v536_v40, %v290_v42 }
  0x38   : > { %v282_v45 = vmul.f32 0.5, %v281_v43 }
  0x39   : > { %v292_v46 = vmul.f32 0.5, %v291_v44 }
  0x3a   : > { %v283_v47 = vsub.f32 1.5, %v282_v45 }
  0x3b   : > { %v293_v48 = vsub.f32 1.5, %v292_v46 }
  0x3c   : > { %v284_v49 = vmul.f32 %v534_v39, %v283_v47 }
  0x3d   : > { %v294_v50 = vmul.f32 %v536_v40, %v293_v48 }
  0x3e   : > { %v288_v51 = vsel %vm287_vm4, %v534_v39, %v284_v49 }
  0x3f   : > { %v319_v52 = vmul.f32 %v288_v51, %v246_v10  ;;  %v321_v53 = vmul.f32 %v288_v51, %v248_v16  ;;  %v298_v54 = vsel %vm297_vm6, %v536_v40, %v294_v50  ;;  %v315_v59 = vmul.f32 %v288_v51, %v640_v3 }
  0x40   : > { %v320_v55 = vmul.f32 %v298_v54, %v247_v11  ;;  %v322_v56 = vmul.f32 %v298_v54, %v249_v17  ;;  %v317_v60 = vmul.f32 %v288_v51, %v642_v4  ;;  %v316_v61 = vmul.f32 %v298_v54, %v644_v5 }
  0x41   : > { %v325_v57 = vpack.c.bf16 %v321_v53, %v319_v52  ;;  %v318_v62 = vmul.f32 %v298_v54, %v650_v8 }
  0x42   : > { %v326_v58 = vpack.c.bf16 %v322_v56, %v320_v55  ;;  %v323_v63 = vpack.c.bf16 %v317_v60, %v315_v59 }
  0x43   : > { %338 = vmatpush.bf16.msra.mxu0 %v325_v57  ;;  %v324_v1 = vpack.c.bf16 %v318_v62, %v316_v61 }
  0x44   : > { %351 = vmatpush.bf16.msra.mxu1 %v326_v58 }
  0x47   : > { %339 = vmatpush.bf16.msra.mxu0 %v323_v63 }
  0x48   : > { %352 = vmatpush.bf16.msra.mxu1 %v324_v1 }
  0x8c   : > { %v303_v2 = vpop.xlane.xlu0 %302 }
  0x8d   : > { %v304_v6 = vmax.f32 %v303_v2, 1e-24 }
  0x8f   : > { %537 = vrsqrt.f32 %v304_v6  ;;  %vm311_vm8 = vweird.f32 %v304_v6 }
  0x95   : > { %v538_v7 = vpop.eup %537 }
  0x96   : > { %v306_v9 = vmul.f32 %v538_v7, %v304_v6  ;;  %vm312_vm7 = vweird.f32 %v538_v7 }
  0x97   : > { %vm313_vm9 = vmor %vm311_vm8, %vm312_vm7 }
  0x98   : > { %v307_v10 = vmul.f32 %v538_v7, %v306_v9 }
  0x9a   : > { %v308_v11 = vmul.f32 0.5, %v307_v10 }
  0x9c   : > { %v309_v3 = vsub.f32 1.5, %v308_v11 }
  0x9e   : > { %v310_v4 = vmul.f32 %v538_v7, %v309_v3 }
  0xa0   : > { %v314_v5 = vsel %vm313_vm9, %v538_v7, %v310_v4 }
  0xa1   : > { %v327_v8 = vmul.f32 %v314_v5, %v631_v0 }
  0xa3   : > { %v328_v12 = vpack.c.bf16 %v327_v8, %v327_v8 }
  0xa5   : > { %491 = vmatmul.msk.bf16.vlgmr.msra.gmra.mxu0 %vm300_vm0, %v328_v12  ;;  %492 = vmatmul.msk.bf16.vlgmr.msra.gmra.mxu1 %vm300_vm0, %v328_v12 }
 0x122   : > { %v341_v14 = vpop.f32.mrf.mxu0  ;;  %v354_v16 = vpop.f32.mrf.mxu1 }
 0x123   : > { %v360_v17 = vmul.f32 %v359_v13, %v341_v14  ;;  %v361_v18 = vmul.f32 %v359_v13, %v354_v16 }
 0x125   : > { %v364_v19 = vadd.f32 %v363_v15, %v360_v17  ;;  %v365_v0 = vadd.f32 %v363_v15, %v361_v18 }
 0x127   : > { %366 = vst [vmem:[%s239_s7] sm:$0xff] %v364_v19 }
 0x128   : > { %367 = vst [vmem:[%s239_s7 + $0x8] sm:$0xff] %v365_v0 }
 0x12a   : > { %v343_v20 = vpop.f32.mrf.mxu0  ;;  %v356_v21 = vpop.f32.mrf.mxu1 }
 0x12b PF: > { %s14_s14 = sadd.s32 1, %s580_s14   ;;  %s680_s12 = smov %s576_s13 }
 0x12c   : > { %p11_p8 = scmp.ge.s32.totalorder %s14_s14, 4   ;;  %s681_s13 = smov %s683_s16 }
 0x12e   :  { %13 = sbr.rel (!%p11_p8) target bundleno = 2 (0x2), region = 70 }
 0x133   :  { %398 = vsyncpa [#allocation3], 1 }
 0x134   :  { %400 = vsyncpa [#allocation3 + $0x1], 1 }

</bundles_post_ra>
